<compile_context>
chip_gen: v7x
topology: tpu7x:2x2x1
jax: 0.10.0
libtpu: 0.0.40
codegen_flags: <defaults>
</compile_context>

<pallas_src>
import functools

import jax
import jax.numpy as jnp
from jax.experimental import pallas as pl
from jax.experimental.pallas import tpu as pltpu


def _round_up(x: int, m: int) -> int:
    return (x + m - 1) // m * m


def _linear_kernel(x_ref, wt_ref, b_ref, o_ref, acc_ref):
    """One (tm, tn) output tile; K-reduction over grid axis 2."""
    k = pl.program_id(2)

    @pl.when(k == 0)
    def _():
        acc_ref[...] = jnp.zeros_like(acc_ref)

    acc_ref[...] += jnp.dot(
        x_ref[...], wt_ref[...], preferred_element_type=jnp.float32
    )

    @pl.when(k == pl.num_programs(2) - 1)
    def _():
        # bias is (1, tn) -> broadcasts over the tm rows
        o_ref[...] = (acc_ref[...] + b_ref[...]).astype(o_ref.dtype)


def prepare_linear_params(w, b, *, tn: int = 128, tk: int = 128):
    """One-time weight layout prep (do this OUTSIDE the per-step hot path).

    w: (out_features, in_features) torch-style weight
    b: (out_features,) bias
    Returns wt_pad: (K_pad, N_pad) = zero-padded W^T, b_pad: (1, N_pad).
    """
    n, k = w.shape
    k_pad, n_pad = _round_up(k, tk), _round_up(n, tn)
    wt_pad = jnp.zeros((k_pad, n_pad), w.dtype).at[:k, :n].set(w.T)
    b_pad = jnp.zeros((1, n_pad), b.dtype).at[0, :n].set(b)
    return wt_pad, b_pad


@functools.partial(jax.jit, static_argnames=("out_features", "tm", "tn", "tk"))
def linear_pallas(x, wt_pad, b_pad, *, out_features: int,
                  tm: int = 128, tn: int = 128, tk: int = 128):
    """y = x @ W^T + b using the pre-padded (K_pad, N_pad) weight.

    x:      (B, in_features) float32
    wt_pad: (K_pad, N_pad)   float32   (from prepare_linear_params)
    b_pad:  (1, N_pad)       float32
    """
    bsz, k = x.shape
    k_pad, n_pad = wt_pad.shape

    # Tile sizes: keep lane dims at 128; shrink tm for tiny batches (>=8 rows).
    tm = min(tm, _round_up(bsz, 8))
    tn = min(tn, n_pad)
    tk = min(tk, k_pad)
    m_pad = _round_up(bsz, tm)

    # Zero-pad activations so every block is full (MXU sees dense K).
    if (m_pad, k_pad) != (bsz, k):
        xp = jnp.zeros((m_pad, k_pad), x.dtype).at[:bsz, :k].set(x)
    else:
        xp = x

    grid = (m_pad // tm, n_pad // tn, k_pad // tk)

    flops = 2 * m_pad * k_pad * n_pad
    bytes_accessed = int(
        (xp.size + wt_pad.size + b_pad.size + m_pad * n_pad) * x.dtype.itemsize
    )

    out = pl.pallas_call(
        _linear_kernel,
        out_shape=jax.ShapeDtypeStruct((m_pad, n_pad), x.dtype),
        grid=grid,
        in_specs=[
            pl.BlockSpec((tm, tk), lambda i, j, kk: (i, kk)),   # x tile
            pl.BlockSpec((tk, tn), lambda i, j, kk: (kk, j)),   # W^T tile
            pl.BlockSpec((1, tn), lambda i, j, kk: (0, j)),     # bias tile
        ],
        out_specs=pl.BlockSpec((tm, tn), lambda i, j, kk: (i, j)),
        scratch_shapes=[pltpu.VMEM((tm, tn), jnp.float32)],
        compiler_params=pltpu.CompilerParams(
            dimension_semantics=("parallel", "parallel", "arbitrary"),
        ),
        cost_estimate=pl.CostEstimate(
            flops=flops, transcendentals=0, bytes_accessed=bytes_accessed
        ),
    )(xp, wt_pad, b_pad)

    # Strip the lane/row padding back off.
    return out[:bsz, :out_features]


if __name__ == "__main__":
    in_features, out_features = 120, 84
    batch = 8

    key = jax.random.PRNGKey(0)
    kx, kw, kb = jax.random.split(key, 3)

    # Deterministic synthetic nn.Linear parameters + input.
    x = jax.random.normal(kx, (batch, in_features), dtype=jnp.float32)
    w = jax.random.normal(kw, (out_features, in_features), dtype=jnp.float32) * 0.05
    b = jax.random.normal(kb, (out_features,), dtype=jnp.float32) * 0.05

    # One-time parameter layout prep (padded, pre-transposed weight).
    wt_pad, b_pad = prepare_linear_params(w, b)

    y = linear_pallas(x, wt_pad, b_pad, out_features=out_features)
    jax.block_until_ready(y)

    # Reference check in plain JAX (matches torch.nn.Linear forward).
    y_ref = x @ w.T + b
    assert y.shape == (batch, out_features)
    assert jnp.allclose(y, y_ref, atol=1e-4, rtol=1e-4), "mismatch vs reference"

    print("KERNEL_OK")
</pallas_src>

<mosaic_0001>
module attributes {stable_mosaic.version = 11 : i64} {
  func.func @_linear_kernel(%arg0: i32, %arg1: i32, %arg2: i32, %arg3: memref<8x128xf32, #tpu.memory_space<vmem>>, %arg4: memref<128x128xf32, #tpu.memory_space<vmem>>, %arg5: memref<1x128xf32, #tpu.memory_space<vmem>>, %arg6: memref<8x128xf32, #tpu.memory_space<vmem>>, %arg7: memref<8x128xf32, #tpu.memory_space<vmem>>) attributes {dimension_semantics = [#tpu.dimension_semantics<parallel>, #tpu.dimension_semantics<parallel>, #tpu.dimension_semantics<arbitrary>], iteration_bounds = array<i64: 1, 1, 1>, scalar_prefetch = 0 : i64, scratch_operands = 1 : i64, tpu.core_type = #tpu.core_type<tc>, window_params = [{transform_indices = @transform_0, window_bounds = array<i64: 8, 128>}, {transform_indices = @transform_1, window_bounds = array<i64: 128, 128>}, {transform_indices = @transform_2, window_bounds = array<i64: 1, 128>}, {transform_indices = @transform_3, window_bounds = array<i64: 8, 128>}]} {
    %c0_i32 = arith.constant 0 : i32
    %0 = arith.cmpi eq, %arg2, %c0_i32 : i32
    %1 = arith.extui %0 : i1 to i32
    %c0_i32_0 = arith.constant 0 : i32
    %2 = arith.cmpi ne, %1, %c0_i32_0 : i32
    scf.if %2 {
      %cst_10 = arith.constant 0.000000e+00 : f32
      %12 = vector.broadcast %cst_10 : f32 to vector<8x128xf32>
      %c0_11 = arith.constant 0 : index
      %c0_12 = arith.constant 0 : index
      %13 = vector.load %arg7[%c0_11, %c0_12] : memref<8x128xf32, #tpu.memory_space<vmem>>, vector<8x128xf32>
      tpu.vector_store %arg7[%c0_11, %c0_12], %12 {strides = array<i32>} : memref<8x128xf32, #tpu.memory_space<vmem>>, vector<8x128xf32>,
    } else {
    }
    %c0 = arith.constant 0 : index
    %c0_1 = arith.constant 0 : index
    %3 = vector.load %arg7[%c0, %c0_1] : memref<8x128xf32, #tpu.memory_space<vmem>>, vector<8x128xf32>
    %c0_2 = arith.constant 0 : index
    %c0_3 = arith.constant 0 : index
    %4 = vector.load %arg3[%c0_2, %c0_3] : memref<8x128xf32, #tpu.memory_space<vmem>>, vector<8x128xf32>
    %c0_4 = arith.constant 0 : index
    %c0_5 = arith.constant 0 : index
    %5 = vector.load %arg4[%c0_4, %c0_5] : memref<128x128xf32, #tpu.memory_space<vmem>>, vector<128x128xf32>
    %cst = arith.constant dense<0.000000e+00> : vector<8x128xf32>
    %6 = tpu.matmul %4, %5, %cst {dimension_numbers = #tpu.dot_dimension_numbers<[1], [0], [0], [1], [0, 0, 1, 1], [], []>} : vector<8x128xf32>, vector<128x128xf32>, vector<8x128xf32> -> vector<8x128xf32>
    %7 = arith.addf %3, %6 : vector<8x128xf32>
    %c0_6 = arith.constant 0 : index
    %c0_7 = arith.constant 0 : index
    %8 = vector.load %arg7[%c0_6, %c0_7] : memref<8x128xf32, #tpu.memory_space<vmem>>, vector<8x128xf32>
    tpu.vector_store %arg7[%c0_6, %c0_7], %7 {strides = array<i32>} : memref<8x128xf32, #tpu.memory_space<vmem>>, vector<8x128xf32>,
    %c0_i32_8 = arith.constant 0 : i32
    %9 = arith.cmpi eq, %arg2, %c0_i32_8 : i32
    %10 = arith.extui %9 : i1 to i32
    %c0_i32_9 = arith.constant 0 : i32
    %11 = arith.cmpi ne, %10, %c0_i32_9 : i32
    scf.if %11 {
      %c0_10 = arith.constant 0 : index
      %c0_11 = arith.constant 0 : index
      %12 = vector.load %arg7[%c0_10, %c0_11] : memref<8x128xf32, #tpu.memory_space<vmem>>, vector<8x128xf32>
      %c0_12 = arith.constant 0 : index
      %c0_13 = arith.constant 0 : index
      %13 = vector.load %arg5[%c0_12, %c0_13] : memref<1x128xf32, #tpu.memory_space<vmem>>, vector<1x128xf32>
      %14 = vector.broadcast %13 : vector<1x128xf32> to vector<8x128xf32>
      %15 = arith.addf %12, %14 : vector<8x128xf32>
      %c0_14 = arith.constant 0 : index
      %c0_15 = arith.constant 0 : index
      %16 = vector.load %arg6[%c0_14, %c0_15] : memref<8x128xf32, #tpu.memory_space<vmem>>, vector<8x128xf32>
      tpu.vector_store %arg6[%c0_14, %c0_15], %15 {strides = array<i32>} : memref<8x128xf32, #tpu.memory_space<vmem>>, vector<8x128xf32>,
    } else {
    }
    return
  }
  func.func @transform_0(%arg0: i32, %arg1: i32, %arg2: i32) -> (i32, i32) {
    %c0_i32 = arith.constant 0 : i32
    return %arg0, %arg2 : i32, i32
  }
  func.func @transform_1(%arg0: i32, %arg1: i32, %arg2: i32) -> (i32, i32) {
    %c0_i32 = arith.constant 0 : i32
    return %arg2, %arg1 : i32, i32
  }
  func.func @transform_2(%arg0: i32, %arg1: i32, %arg2: i32) -> (i32, i32) {
    %c0_i32 = arith.constant 0 : i32
    %c0_i32_0 = arith.constant 0 : i32
    return %c0_i32, %arg1 : i32, i32
  }
  func.func @transform_3(%arg0: i32, %arg1: i32, %arg2: i32) -> (i32, i32) {
    %c0_i32 = arith.constant 0 : i32
    return %arg0, %arg1 : i32, i32
  }
}

</mosaic_0001>

<bundles_post_ra>
// kernel: linear_pallas.1
= control target key start
LH: loop header
LB: loop body
LE: loop exit
PB: predicated region body
PF: predicated region fallthrough
CT: control target
= control target key end

     0   :  { %8 = vsyncpa [#allocation4], 0  ;;  %s341_s0 = inlined_call_operand.vmem [shape: f32[8,128], index: 0, kind: input, shape index: {}]   ;;  %s342_s1 = inlined_call_operand.hbm [shape: f32[128,128], index: 1, kind: input, shape index: {}]   ;;  %s343_s2 = inlined_call_operand.vmem [shape: f32[1,128], index: 2, kind: input, shape index: {}]   ;;  %s344_s3 = inlined_call_operand.hbm [shape: f32[8,128], index: 3, kind: output, shape index: {}]  }
   0x1   :  { %9 = vsyncpa [#allocation5], 0  ;;  %s284_s12 = smov [#allocation3]   ;;  %s236_s16 = scalar_lea.hbm %s342_s1, 2048 }
   0x2   :  { %s17_s13 = sshll.u32 %s284_s12, 4  ;;  %p237_p0 = scmp.ne.s32.totalorder %s342_s1, %s236_s16  ;;  %s18_s13 = int_to_ptr.vmem [resolvable:$true] %s17_s13 }
   0x3   :  { %p240_p1 = scmp.lt.u32.totalorder %s236_s16, %s342_s1 }
   0x5   :  { %p242_p2 = pnand %p240_p1, %p237_p0 }
   0x7   :  { %245 = shalt.err (!%p242_p2)
}
   0x8   :  { %s246_s21 = scalar_lea.vmem %s18_s13, 2048  ;;  %p251_p4 = scmp.lt.s32.totalorder %s18_s13, %s18_s13 }
   0x9   :  { %p247_p3 = scmp.ne.s32.totalorder %s18_s13, %s246_s21  ;;  %p252_p5 = scmp.lt.s32.totalorder %s246_s21, %s246_s21 }
   0xb   :  { %p253_p6 = por %p252_p5, %p251_p4 }
   0xd   :  { %p254_p7 = pnand %p253_p6, %p247_p3 }
   0xf   :  { %257 = shalt.err (!%p254_p7)
}
  0x10   :  { %s285_s22 = smov 128   ;;  %s286_s23 = smov 8  }
  0x11   :  { %23 = dma.hbm_to_vmem [thread:$0]  %s342_s1, 2048, %s18_s13, [#allocation4], %s285_s22, %s285_s22, %s286_s23  }
  0x12   :  { %280 = dma.done.wait [#allocation4], 2048  }
  0x13   :  { %281 = vsyncadd [#allocation4], 4294965248  ;;  %v287_v0 = vmov 0.0|0.0   ;;  %vm288_vm0 = vmmov 0   ;;  %v289_v1 = vmov 0.0   ;;  %v36_v2 = vld [vmem:[#allocation3] sm:$0xff] }
  0x14   :  { %205 = vmatprep.subr.bf16.mxu0 %v287_v0  ;;  %202 = vmatprep.mubr.msk.f32.mxu0 %vm288_vm0, %v289_v1  ;;  %v37_v3 = vld [vmem:[#allocation3 + $0x8] sm:$0xff]  ;;  %v38_v4 = vld [vmem:[#allocation3 + $0x10] sm:$0xff]  ;;  %v39_v6 = vld [vmem:[#allocation3 + $0x18] sm:$0xff]  ;;  %s290_s29 = smov [#allocation6]  }
  0x15   :  { %v206_v5 = vpack.c.bf16 %v37_v3, %v36_v2  ;;  %v209_v7 = vpack.c.bf16 %v39_v6, %v38_v4  ;;  %v40_v8 = vld [vmem:[#allocation3 + $0x20] sm:$0xff]  ;;  %v41_v9 = vld [vmem:[#allocation3 + $0x28] sm:$0xff]  ;;  %v42_v11 = vld [vmem:[#allocation3 + $0x30] sm:$0xff]  ;;  %s143_s30 = sshll.u32 %s290_s29, 4  ;;  %s144_s30 = int_to_ptr.vmem [resolvable:$true] %s143_s30 }
  0x16   :  { %v212_v10 = vpack.c.bf16 %v41_v9, %v40_v8  ;;  %v43_v12 = vld [vmem:[#allocation3 + $0x38] sm:$0xff]  ;;  %v44_v14 = vld [vmem:[#allocation3 + $0x40] sm:$0xff]  ;;  %v45_v15 = vld [vmem:[#allocation3 + $0x48] sm:$0xff]  ;;  %s258_s4 = scalar_lea.vmem %s144_s30, 128  ;;  %p263_p9 = scmp.lt.s32.totalorder %s144_s30, %s144_s30 }
  0x17   :  { %207 = vmatpush3.bf16.msra.mxu0 %v206_v5  ;;  %v215_v13 = vpack.c.bf16 %v43_v12, %v42_v11  ;;  %v218_v16 = vpack.c.bf16 %v45_v15, %v44_v14  ;;  %v46_v17 = vld [vmem:[#allocation3 + $0x50] sm:$0xff]  ;;  %v47_v18 = vld [vmem:[#allocation3 + $0x58] sm:$0xff]  ;;  %v48_v20 = vld [vmem:[#allocation3 + $0x60] sm:$0xff]  ;;  %p259_p8 = scmp.ne.s32.totalorder %s144_s30, %s258_s4  ;;  %p264_p10 = scmp.lt.s32.totalorder %s258_s4, %s258_s4 }
  0x18   :  { %208 = vmatprep.subr.bf16.mxu0 %v287_v0  ;;  %v221_v19 = vpack.c.bf16 %v47_v18, %v46_v17  ;;  %v49_v21 = vld [vmem:[#allocation3 + $0x68] sm:$0xff]  ;;  %v50_v23 = vld [vmem:[#allocation3 + $0x70] sm:$0xff]  ;;  %v51_v24 = vld [vmem:[#allocation3 + $0x78] sm:$0xff] }
  0x19   :  { %v224_v22 = vpack.c.bf16 %v49_v21, %v48_v20  ;;  %v227_v25 = vpack.c.bf16 %v51_v24, %v50_v23  ;;  %v35_v26 = vld [vmem:[%s341_s0] sm:$0xff]  ;;  %p265_p11 = por %p264_p10, %p263_p9 }
  0x1a   :  { %v152_v27 = vld [vmem:[%s343_s2] ss:$0 sm:$0xff] }
  0x1b   :  { %210 = vmatpush3.bf16.msra.mxu0 %v209_v7  ;;  %p266_p12 = pnand %p265_p11, %p259_p8 }
  0x1c   :  { %211 = vmatprep.subr.bf16.mxu0 %v287_v0 }
  0x1f   :  { %213 = vmatpush3.bf16.msra.mxu0 %v212_v10 }
  0x20   :  { %214 = vmatprep.subr.bf16.mxu0 %v287_v0 }
  0x23   :  { %216 = vmatpush3.bf16.msra.mxu0 %v215_v13 }
  0x24   :  { %217 = vmatprep.subr.bf16.mxu0 %v287_v0 }
  0x27   :  { %219 = vmatpush3.bf16.msra.mxu0 %v218_v16 }
  0x28   :  { %220 = vmatprep.subr.bf16.mxu0 %v287_v0 }
  0x2b   :  { %222 = vmatpush3.bf16.msra.mxu0 %v221_v19 }
  0x2c   :  { %223 = vmatprep.subr.bf16.mxu0 %v287_v0 }
  0x2f   :  { %225 = vmatpush3.bf16.msra.mxu0 %v224_v22 }
  0x30   :  { %226 = vmatprep.subr.bf16.mxu0 %v287_v0 }
  0x33   :  { %228 = vmatpush3.bf16.msra.mxu0 %v227_v25 }
  0x36   :  { %203 = vmatmul.mubr.f32.vlgmr.msra.gmra.mrb[0].mxu0 %v35_v26 }
 0x109   :  { %v118_v28 = vpop.f32.mrb[0].mxu0 }
 0x10a   :  { %v135_v29 = vadd.f32 %v152_v27, %v118_v28  ;;  %v204_v30 = vpop.f32.mrb[1].mxu0 }
 0x10c   :  { %136 = vst [vmem:[#allocation6] sm:$0xff] %v135_v29 }
 0x10d   :  { %269 = shalt.err (!%p266_p12)
}
 0x10e   :  { %s270_s6 = scalar_lea.hbm %s344_s3, 128 }
 0x10f   :  { %p271_p13 = scmp.ne.s32.totalorder %s344_s3, %s270_s6  ;;  %p274_p0 = scmp.lt.u32.totalorder %s270_s6, %s344_s3 }
 0x111   :  { %p276_p1 = pnand %p274_p0, %p271_p13 }
 0x113   :  { %279 = shalt.err (!%p276_p1)
}
 0x114   :  { %146 = dma.vmem_to_hbm [thread:$0]  %s144_s30, 128, %s344_s3, [#allocation5]  }
 0x115   :  { %282 = dma.done.wait [#allocation5], 128  }
 0x116   :  { %283 = vsyncadd [#allocation5], 4294967168 }
 0x117   :  { %150 = vsyncpa [#allocation4], 1 }
 0x118   :  { %151 = vsyncpa [#allocation5], 1 }

</bundles_post_ra>
